<compile_context>
chip_gen: v6e
topology: v6e:2x2x1
jax: 0.10.0
libtpu: 0.0.40
codegen_flags: <defaults>
</compile_context>

<pallas_src>
import jax
import jax.numpy as jnp
from jax.experimental import pallas as pl
from jax.experimental.pallas import tpu as pltpu


def _copy_kernel(z_ref, o_ref):
    # Straight full-vreg vld -> vst copy; the unsqueeze happens for free in
    # the wrapper on the lane-dense 2-D output.
    o_ref[...] = z_ref[...]


def _sublane_multiple(dtype) -> int:
    # Native sublane packing: 8 rows (4-byte), 16 (2-byte), 32 (1-byte).
    itemsize = jnp.dtype(dtype).itemsize
    return max(8, 32 // max(itemsize, 1))


def _pick_lane_width(total_elems: int, max_lane: int = 1024) -> int:
    # Largest multiple of 128 (capped at max_lane) dividing the flat element
    # count; 0 means "cannot form a lane-dense slab".
    best = 0
    lane = 128
    while lane <= max_lane:
        if total_elems % lane == 0:
            best = lane
        lane += 128
    return best


def dummy_mapping(z, c=None, *, use_pallas=False, block_rows=None,
                  alias_input=False, vmem_limit_bytes=32 * 1024 * 1024,
                  **kwargs):
    """JAX equivalent of DummyMapping.forward(z, c) -> z.unsqueeze(1)."""
    del c, kwargs  # accepted but unused, matching the PyTorch module

    if not use_pallas:
        # Production path on every generation: metadata-only reshape.
        return z[:, None, :]

    n, zdim = z.shape
    total = n * zdim
    itemsize = jnp.dtype(z.dtype).itemsize
    sub = _sublane_multiple(z.dtype)
    lane = _pick_lane_width(total)
    io_alias = {0: 0} if alias_input else {}
    bytes_accessed = 2 * total * itemsize

    if lane == 0 or (total // lane) < 2 * sub:
        # Tiny / non-lane-dense-able input: single whole-array block in VMEM
        # (full-dim blocks are exempt from the (8,128) divisibility rule).
        out2d = pl.pallas_call(
            _copy_kernel,
            out_shape=jax.ShapeDtypeStruct((n, zdim), z.dtype),
            input_output_aliases=io_alias,
            compiler_params=pltpu.CompilerParams(
                vmem_limit_bytes=vmem_limit_bytes),
            cost_estimate=pl.CostEstimate(
                flops=0, transcendentals=0, bytes_accessed=bytes_accessed),
        )(z)
        return out2d[:, None, :]

    # Lane-dense path: flatten to a (rows, lane) slab.  The reshape is layout
    # plumbing in the wrapper, not in-kernel compute.
    rows = total // lane
    z_flat = z.reshape(rows, lane)

    # Tile sizing: ~limit/8 bytes per tile -> 4 double-buffered tiles stay
    # around half the explicit VMEM limit (headroom for Pallas overhead).
    tile_budget_bytes = vmem_limit_bytes // 8
    max_rows = max(sub, (tile_budget_bytes // (lane * itemsize)) // sub * sub)
    if block_rows is None:
        tm = max_rows
    else:
        tm = max(sub, (block_rows // sub) * sub)  # clamp to sublane multiple
        tm = min(tm, max_rows)
    # v7x megacore: keep >= 2 grid blocks so both TensorCores stream the copy.
    tm = min(tm, max(sub, (rows // 2) // sub * sub))
    tm = min(tm, rows)
    # Prefer a tm that divides rows (no masked remainder block).
    for cand in range(tm, max(sub, tm // 2) - 1, -sub):
        if rows % cand == 0:
            tm = cand
            break

    grid = (pl.cdiv(rows, tm),)

    out_flat = pl.pallas_call(
        _copy_kernel,
        out_shape=jax.ShapeDtypeStruct((rows, lane), z.dtype),
        grid=grid,
        in_specs=[pl.BlockSpec((tm, lane), lambda i: (i, 0))],
        out_specs=pl.BlockSpec((tm, lane), lambda i: (i, 0)),
        input_output_aliases=io_alias,
        compiler_params=pltpu.CompilerParams(
            dimension_semantics=("parallel",),
            vmem_limit_bytes=vmem_limit_bytes,
        ),
        cost_estimate=pl.CostEstimate(
            flops=0, transcendentals=0, bytes_accessed=bytes_accessed),
    )(z_flat)

    # unsqueeze(1): free metadata reshape in the wrapper.
    return out_flat.reshape(n, 1, zdim)


if __name__ == "__main__":
    key = jax.random.PRNGKey(0)
    kz, kc, kz2, kz3 = jax.random.split(key, 4)

    # Small shapes consistent with a GAN mapping-network input.
    N, ZDIM, CDIM = 2, 32, 4
    z = jax.random.normal(kz, (N, ZDIM), dtype=jnp.float32)
    c = jax.random.normal(kc, (N, CDIM), dtype=jnp.float32)  # unused, like PyTorch
    ref = z[:, None, :]

    # Default (production) path: no kernel, metadata reshape only.
    out_default = jax.block_until_ready(dummy_mapping(z, c))
    assert out_default.shape == (N, 1, ZDIM)
    assert out_default.dtype == z.dtype
    assert jnp.array_equal(out_default, ref)

    # Pallas path, tiny input -> whole-array single-block fallback.
    out_pallas = jax.block_until_ready(dummy_mapping(z, c, use_pallas=True))
    assert out_pallas.shape == (N, 1, ZDIM)
    assert out_pallas.dtype == z.dtype
    assert jnp.array_equal(out_pallas, ref)

    # Pallas path, lane-dense tiled f32 slab (rows=16, lane=1024, grid=(2,)).
    N2, ZDIM2 = 64, 256
    z2 = jax.random.normal(kz2, (N2, ZDIM2), dtype=jnp.float32)
    out2 = jax.block_until_ready(dummy_mapping(z2, None, use_pallas=True))
    assert out2.shape == (N2, 1, ZDIM2)
    assert jnp.array_equal(out2, z2[:, None, :])

    # Pallas path, bf16 (sublane multiple 16) lane-dense tiled slab.
    N3, ZDIM3 = 64, 512
    z3 = jax.random.normal(kz3, (N3, ZDIM3), dtype=jnp.float32).astype(jnp.bfloat16)
    out3 = jax.block_until_ready(dummy_mapping(z3, None, use_pallas=True))
    assert out3.shape == (N3, 1, ZDIM3)
    assert out3.dtype == jnp.bfloat16
    assert jnp.array_equal(out3, z3[:, None, :])

    print("KERNEL_OK")
</pallas_src>

<mosaic_0001>
module attributes {stable_mosaic.version = 11 : i64} {
  func.func @_copy_kernel(%arg0: memref<2x32xf32, #tpu.memory_space<vmem>>, %arg1: memref<2x32xf32, #tpu.memory_space<vmem>>) attributes {dimension_semantics = [], scalar_prefetch = 0 : i64, scratch_operands = 0 : i64, tpu.core_type = #tpu.core_type<tc>} {
    %c0 = arith.constant 0 : index
    %c0_0 = arith.constant 0 : index
    %0 = vector.load %arg0[%c0, %c0_0] : memref<2x32xf32, #tpu.memory_space<vmem>>, vector<2x32xf32>
    %c0_1 = arith.constant 0 : index
    %c0_2 = arith.constant 0 : index
    %1 = vector.load %arg1[%c0_1, %c0_2] : memref<2x32xf32, #tpu.memory_space<vmem>>, vector<2x32xf32>
    tpu.vector_store %arg1[%c0_1, %c0_2], %0 {strides = array<i32>} : memref<2x32xf32, #tpu.memory_space<vmem>>, vector<2x32xf32>,
    return
  }
}

</mosaic_0001>

<bundles_post_ra>
// kernel: tpu_custom_call.1
= control target key start
LH: loop header
LB: loop body
LE: loop exit
PB: predicated region body
PF: predicated region fallthrough
CT: control target
= control target key end

     0   :  { %6 = vsyncpa [#allocation3], 0  ;;  %s103_s0 = inlined_call_operand.hbm [shape: f32[2,32], index: 0, kind: input, shape index: {}]   ;;  %s104_s1 = inlined_call_operand.hbm [shape: f32[2,32], index: 1, kind: output, shape index: {}]  }
   0x1   :  { %7 = vsyncpa [#allocation4], 0  ;;  %s85_s6 = smov [#allocation2]  }
   0x2   :  { %s14_s7 = sshll.u32 %s85_s6, 4  ;;  %s15_s7 = int_to_ptr.vmem [resolvable:$true] %s14_s7 }
   0x3   :  { %s49_s8 = scalar_lea.vmem %s15_s7, 32  ;;  %p54_p1 = scmp.lt.s32.totalorder %s15_s7, %s15_s7 }
   0x4   :  { %p50_p0 = scmp.ne.s32.totalorder %s15_s7, %s49_s8  ;;  %p55_p2 = scmp.lt.s32.totalorder %s49_s8, %s49_s8 }
   0x6   :  { %p56_p3 = por %p55_p2, %p54_p1 }
   0x8   :  { %p57_p4 = pnand %p56_p3, %p50_p0 }
   0xa   :  { %60 = shalt.err (!%p57_p4)
}
   0xb   :  { %17 = dma.hbm_to_vmem [thread:$0]  %s103_s0, 32, %s15_s7, [#allocation3]  }
   0xc   :  { %81 = dma.done.wait [#allocation3], 32  }
   0xd   :  { %82 = vsyncadd [#allocation3], 4294967264  ;;  %s86_s11 = smov [#allocation5]   ;;  %vm22_vm0 = vcmask 254976   ;;  %v21_v0 = vld [vmem:[#allocation2] sm:$0x3] }
   0xe   :  { %s30_s12 = sshll.u32 %s86_s11, 4  ;;  %23 = vst.msk [vmem:[#allocation5] sm:$0x3] %vm22_vm0, %v21_v0  ;;  %s31_s12 = int_to_ptr.vmem [resolvable:$true] %s30_s12 }
   0xf   :  { %s61_s13 = scalar_lea.vmem %s31_s12, 32  ;;  %p66_p6 = scmp.lt.s32.totalorder %s31_s12, %s31_s12 }
  0x10   :  { %p62_p5 = scmp.ne.s32.totalorder %s31_s12, %s61_s13  ;;  %p67_p7 = scmp.lt.s32.totalorder %s61_s13, %s61_s13 }
  0x12   :  { %p68_p8 = por %p67_p7, %p66_p6 }
  0x14   :  { %p69_p9 = pnand %p68_p8, %p62_p5 }
  0x16   :  { %72 = shalt.err (!%p69_p9)
}
  0x17   :  { %33 = dma.vmem_to_hbm [thread:$0]  %s31_s12, 32, %s104_s1, [#allocation4]  }
  0x18   :  { %83 = dma.done.wait [#allocation4], 32  }
  0x19   :  { %84 = vsyncadd [#allocation4], 4294967264 }
  0x1a   :  { %37 = vsyncpa [#allocation3], 1 }
  0x1b   :  { %38 = vsyncpa [#allocation4], 1 }

</bundles_post_ra>
